<compile_context>
chip_gen: v7x
topology: tpu7x:2x2x1
jax: 0.10.0
libtpu: 0.0.40
codegen_flags: <defaults>
</compile_context>

<pallas_src>
import functools

import jax
import jax.numpy as jnp
from jax import lax
from jax.experimental import pallas as pl
from jax.experimental.pallas import tpu as pltpu

EPS = 1e-07  # EntityMaskedLoss.EPS

_TB_CAP = 512    # max batch rows per tile
_TM_CAP = 2048   # max encounters per tile (multiple of 128)
_LANES = 128     # vreg lane width


def _contagion_loss_kernel(logit_ref, label_ref, mask_ref, out_ref, num_ref, den_ref,
                           *, m_total, block_m, lanes, nchunk, mask_tail):
    """grid = (n_b_tiles, n_m_tiles); axis 1 (M) is the masked-sum reduction axis."""
    k = pl.program_id(1)

    @pl.when(k == 0)
    def _():
        num_ref[...] = jnp.zeros_like(num_ref)
        den_ref[...] = jnp.zeros_like(den_ref)

    # Stream at native (possibly narrow) dtype, upcast in-register; all math stays f32.
    x = logit_ref[...].astype(jnp.float32)   # (TB, TM)
    z = label_ref[...].astype(jnp.float32)   # (TB, TM)
    m = mask_ref[...].astype(jnp.float32)    # (TB, TM)

    # Numerically-stable BCE with logits (matches torch.nn.BCEWithLogitsLoss, 'none').
    bce = jnp.maximum(x, 0.0) - x * z + jnp.log1p(jnp.exp(-jnp.abs(x)))
    bm = bce * m

    if mask_tail:
        # Ragged M tail: the last M block extends past M and its out-of-bounds lanes
        # hold undefined data (possibly inf/NaN).  Gate both the product and the mask
        # with a column-validity mask (select discards NaN on the untaken side).
        col = k * block_m + lax.broadcasted_iota(jnp.int32, bm.shape, 1)
        in_bounds = col < m_total
        bm = jnp.where(in_bounds, bm, 0.0)
        m = jnp.where(in_bounds, m, 0.0)

    # Lane-dense accumulation: fold TM lanes into `lanes`-wide partial sums with pure
    # VPU adds; the cross-lane (XLU) reduce happens exactly once, in the finalize block.
    pn = bm[:, 0:lanes]
    pd = m[:, 0:lanes]
    for c in range(1, nchunk):
        s = slice(c * lanes, (c + 1) * lanes)
        pn = pn + bm[:, s]
        pd = pd + m[:, s]
    num_ref[...] += pn
    den_ref[...] += pd

    @pl.when(k == pl.num_programs(1) - 1)
    def _():
        num = jnp.sum(num_ref[...], axis=-1, keepdims=True)   # (TB, 1)
        den = jnp.sum(den_ref[...], axis=-1, keepdims=True)   # (TB, 1)
        out_ref[...] = (num / (den + EPS)).astype(out_ref.dtype)


def _round_up(x, m):
    return ((x + m - 1) // m) * m


def _pick_tiles(B, M):
    # M tile: full extent when it fits (always a legal block), else the 128-aligned cap.
    TM = M if M <= _TM_CAP else _TM_CAP
    # B tile: full extent for small B; otherwise a multiple of 16 (safe sublane
    # granularity down to bf16 inputs) chosen so the "parallel" B axis has >= 2 tiles,
    # letting v7x's two TensorCores both take work (near-free on v5e/v6e).
    if B <= 16:
        TB = B
    else:
        TB = min(_round_up(pl.cdiv(B, 2), 16), _TB_CAP, _round_up(B, 16))
    return TB, TM


def contagion_loss(encounter_variables, encounter_is_contagion, mask):
    """encounter_variables: (B, M, C); encounter_is_contagion: (B, M, 1) or (B, M);
    mask: (B, M).  Labels / mask may be any narrow dtype (bool/int8/bf16/f32) — they
    are streamed at native dtype and upcast in-register inside the kernel."""
    logits = encounter_variables[:, :, 0]                       # (B, M) — keep f32 for parity
    labels = (encounter_is_contagion[:, :, 0]
              if encounter_is_contagion.ndim == 3 else encounter_is_contagion)
    B, M = logits.shape
    assert labels.shape == (B, M) and mask.shape == (B, M)

    TB, TM = _pick_tiles(B, M)
    grid = (pl.cdiv(B, TB), pl.cdiv(M, TM))   # no wrapper padding; tails masked in-kernel

    if TM % _LANES == 0:
        lanes, nchunk = _LANES, TM // _LANES
    else:                                      # small / odd full-extent M tile
        lanes, nchunk = TM, 1
    mask_tail = (M % TM) != 0

    kernel = functools.partial(
        _contagion_loss_kernel,
        m_total=M, block_m=TM, lanes=lanes, nchunk=nchunk, mask_tail=mask_tail)

    # Double-buffered per-step input bytes; keep the scoped-VMEM limit comfortably above
    # that and under ~48 MiB so it also fits v7x's 64 MiB physical VMEM.
    step_bytes = TB * TM * (logits.dtype.itemsize + labels.dtype.itemsize + mask.dtype.itemsize)
    vmem_limit = int(min(48 * 2**20, max(32 * 2**20, 3 * step_bytes + (4 << 20))))

    per_sample = pl.pallas_call(
        kernel,
        out_shape=jax.ShapeDtypeStruct((B, 1), jnp.float32),
        grid_spec=pltpu.PrefetchScalarGridSpec(
            num_scalar_prefetch=0,
            grid=grid,
            in_specs=[
                pl.BlockSpec((TB, TM), lambda i, k: (i, k)),   # logits (f32)
                pl.BlockSpec((TB, TM), lambda i, k: (i, k)),   # labels (native dtype)
                pl.BlockSpec((TB, TM), lambda i, k: (i, k)),   # mask   (native dtype)
            ],
            out_specs=pl.BlockSpec((TB, 1), lambda i, k: (i, 0)),
            scratch_shapes=[
                pltpu.VMEM((TB, lanes), jnp.float32),   # lane-dense numerator partials
                pltpu.VMEM((TB, lanes), jnp.float32),   # lane-dense denominator partials
            ],
        ),
        compiler_params=pltpu.CompilerParams(
            dimension_semantics=("parallel", "arbitrary"),
            vmem_limit_bytes=vmem_limit,
        ),
    )(logits, labels, mask)

    return jnp.mean(per_sample)


def _reference_loss(encounter_variables, encounter_is_contagion, mask):
    # Pure-JAX reference of the same forward, for a correctness check.
    x = encounter_variables[:, :, 0].astype(jnp.float32)
    z = (encounter_is_contagion[:, :, 0] if encounter_is_contagion.ndim == 3
         else encounter_is_contagion).astype(jnp.float32)
    m = mask.astype(jnp.float32)
    bce = jnp.maximum(x, 0.0) - x * z + jnp.log1p(jnp.exp(-jnp.abs(x)))
    per_sample = jnp.sum(bce * m, axis=-1) / (jnp.sum(m, axis=-1) + EPS)
    return jnp.mean(per_sample)


def _make_inputs(key, B, M, C, p_pos=0.2):
    k1, k2, k3 = jax.random.split(key, 3)
    encounter_variables = jax.random.normal(k1, (B, M, C), dtype=jnp.float32)
    # Narrow dtypes at the *producer* (no wrapper-side casts): binary labels / mask are
    # exactly representable in bf16 and are streamed natively by the kernel.
    encounter_is_contagion = (jax.random.uniform(k2, (B, M, 1)) < p_pos).astype(jnp.bfloat16)
    valid_len = jax.random.randint(k3, (B,), 1, M + 1)
    mask = (jnp.arange(M)[None, :] < valid_len[:, None]).astype(jnp.bfloat16)
    return encounter_variables, encounter_is_contagion, mask


if __name__ == "__main__":
    key = jax.random.PRNGKey(0)
    k_small, k_big = jax.random.split(key, 2)

    # Small shape consistent with the module: B=2, M=16 encounters, C=4 encounter variables.
    ev, labels, mask = _make_inputs(k_small, B=2, M=16, C=4)
    loss = contagion_loss(ev, labels, mask)
    jax.block_until_ready(loss)
    ref = _reference_loss(ev, labels, mask)
    assert jnp.allclose(loss, ref, rtol=1e-5, atol=1e-5), (loss, ref)

    # Second case: exercises 2 B tiles (one partial), multiple M tiles, the ragged
    # M-tail iota mask (2304 % 2048 != 0), and the lane-dense chunked accumulation.
    ev2, labels2, mask2 = _make_inputs(k_big, B=20, M=2304, C=4)
    loss2 = contagion_loss(ev2, labels2, mask2)
    jax.block_until_ready(loss2)
    ref2 = _reference_loss(ev2, labels2, mask2)
    assert jnp.allclose(loss2, ref2, rtol=1e-5, atol=1e-5), (loss2, ref2)

    print("KERNEL_OK")
</pallas_src>

<mosaic_0001>
module attributes {stable_mosaic.version = 11 : i64} {
  func.func @_contagion_loss_kernel(%arg0: i32, %arg1: i32, %arg2: memref<2x16xf32, #tpu.memory_space<vmem>>, %arg3: memref<2x16xbf16, #tpu.memory_space<vmem>>, %arg4: memref<2x16xbf16, #tpu.memory_space<vmem>>, %arg5: memref<2x1xf32, #tpu.memory_space<vmem>>, %arg6: memref<2x16xf32, #tpu.memory_space<vmem>>, %arg7: memref<2x16xf32, #tpu.memory_space<vmem>>) attributes {dimension_semantics = [#tpu.dimension_semantics<parallel>, #tpu.dimension_semantics<arbitrary>], iteration_bounds = array<i64: 1, 1>, scalar_prefetch = 0 : i64, scratch_operands = 2 : i64, tpu.core_type = #tpu.core_type<tc>, window_params = [{transform_indices = @transform_0, window_bounds = array<i64: 2, 16>}, {transform_indices = @transform_1, window_bounds = array<i64: 2, 16>}, {transform_indices = @transform_2, window_bounds = array<i64: 2, 16>}, {transform_indices = @transform_3, window_bounds = array<i64: 2, 1>}]} {
    %c0_i32 = arith.constant 0 : i32
    %0 = arith.cmpi eq, %arg1, %c0_i32 : i32
    %1 = arith.extui %0 : i1 to i32
    %c0_i32_0 = arith.constant 0 : i32
    %2 = arith.cmpi ne, %1, %c0_i32_0 : i32
    scf.if %2 {
      %cst_17 = arith.constant 0.000000e+00 : f32
      %28 = vector.broadcast %cst_17 : f32 to vector<2x16xf32>
      %c0_18 = arith.constant 0 : index
      %c0_19 = arith.constant 0 : index
      %29 = vector.load %arg6[%c0_18, %c0_19] : memref<2x16xf32, #tpu.memory_space<vmem>>, vector<2x16xf32>
      tpu.vector_store %arg6[%c0_18, %c0_19], %28 {strides = array<i32>} : memref<2x16xf32, #tpu.memory_space<vmem>>, vector<2x16xf32>,
      %cst_20 = arith.constant 0.000000e+00 : f32
      %30 = vector.broadcast %cst_20 : f32 to vector<2x16xf32>
      %c0_21 = arith.constant 0 : index
      %c0_22 = arith.constant 0 : index
      %31 = vector.load %arg7[%c0_21, %c0_22] : memref<2x16xf32, #tpu.memory_space<vmem>>, vector<2x16xf32>
      tpu.vector_store %arg7[%c0_21, %c0_22], %30 {strides = array<i32>} : memref<2x16xf32, #tpu.memory_space<vmem>>, vector<2x16xf32>,
    } else {
    }
    %c0 = arith.constant 0 : index
    %c0_1 = arith.constant 0 : index
    %3 = vector.load %arg2[%c0, %c0_1] : memref<2x16xf32, #tpu.memory_space<vmem>>, vector<2x16xf32>
    %c0_2 = arith.constant 0 : index
    %c0_3 = arith.constant 0 : index
    %4 = vector.load %arg3[%c0_2, %c0_3] : memref<2x16xbf16, #tpu.memory_space<vmem>>, vector<2x16xbf16>
    %5 = arith.extf %4 : vector<2x16xbf16> to vector<2x16xf32>
    %c0_4 = arith.constant 0 : index
    %c0_5 = arith.constant 0 : index
    %6 = vector.load %arg4[%c0_4, %c0_5] : memref<2x16xbf16, #tpu.memory_space<vmem>>, vector<2x16xbf16>
    %7 = arith.extf %6 : vector<2x16xbf16> to vector<2x16xf32>
    %cst = arith.constant 0.000000e+00 : f32
    %8 = vector.broadcast %cst : f32 to vector<2x16xf32>
    %9 = arith.maximumf %3, %8 : vector<2x16xf32>
    %10 = arith.mulf %3, %5 : vector<2x16xf32>
    %11 = arith.subf %9, %10 : vector<2x16xf32>
    %12 = math.absf %3 : vector<2x16xf32>
    %cst_6 = arith.constant 0.000000e+00 : f32
    %13 = vector.broadcast %cst_6 : f32 to vector<2x16xf32>
    %14 = arith.subf %13, %12 : vector<2x16xf32>
    %15 = math.exp %14 : vector<2x16xf32>
    %16 = math.log1p %15 : vector<2x16xf32>
    %17 = arith.addf %11, %16 : vector<2x16xf32>
    %18 = arith.mulf %17, %7 : vector<2x16xf32>
    %c0_7 = arith.constant 0 : index
    %c0_8 = arith.constant 0 : index
    %19 = vector.load %arg6[%c0_7, %c0_8] : memref<2x16xf32, #tpu.memory_space<vmem>>, vector<2x16xf32>
    %20 = arith.addf %19, %18 : vector<2x16xf32>
    %c0_9 = arith.constant 0 : index
    %c0_10 = arith.constant 0 : index
    %21 = vector.load %arg6[%c0_9, %c0_10] : memref<2x16xf32, #tpu.memory_space<vmem>>, vector<2x16xf32>
    tpu.vector_store %arg6[%c0_9, %c0_10], %20 {strides = array<i32>} : memref<2x16xf32, #tpu.memory_space<vmem>>, vector<2x16xf32>,
    %c0_11 = arith.constant 0 : index
    %c0_12 = arith.constant 0 : index
    %22 = vector.load %arg7[%c0_11, %c0_12] : memref<2x16xf32, #tpu.memory_space<vmem>>, vector<2x16xf32>
    %23 = arith.addf %22, %7 : vector<2x16xf32>
    %c0_13 = arith.constant 0 : index
    %c0_14 = arith.constant 0 : index
    %24 = vector.load %arg7[%c0_13, %c0_14] : memref<2x16xf32, #tpu.memory_space<vmem>>, vector<2x16xf32>
    tpu.vector_store %arg7[%c0_13, %c0_14], %23 {strides = array<i32>} : memref<2x16xf32, #tpu.memory_space<vmem>>, vector<2x16xf32>,
    %c0_i32_15 = arith.constant 0 : i32
    %25 = arith.cmpi eq, %arg1, %c0_i32_15 : i32
    %26 = arith.extui %25 : i1 to i32
    %c0_i32_16 = arith.constant 0 : i32
    %27 = arith.cmpi ne, %26, %c0_i32_16 : i32
    scf.if %27 {
      %c0_17 = arith.constant 0 : index
      %c0_18 = arith.constant 0 : index
      %28 = vector.load %arg6[%c0_17, %c0_18] : memref<2x16xf32, #tpu.memory_space<vmem>>, vector<2x16xf32>
      %cst_19 = arith.constant dense<0.000000e+00> : vector<2xf32>
      %29 = vector.multi_reduction <add>, %28, %cst_19 [1] : vector<2x16xf32> to vector<2xf32>
      %30 = vector.shape_cast %29 : vector<2xf32> to vector<2x1xf32>
      %c0_20 = arith.constant 0 : index
      %c0_21 = arith.constant 0 : index
      %31 = vector.load %arg7[%c0_20, %c0_21] : memref<2x16xf32, #tpu.memory_space<vmem>>, vector<2x16xf32>
      %cst_22 = arith.constant dense<0.000000e+00> : vector<2xf32>
      %32 = vector.multi_reduction <add>, %31, %cst_22 [1] : vector<2x16xf32> to vector<2xf32>
      %33 = vector.shape_cast %32 : vector<2xf32> to vector<2x1xf32>
      %cst_23 = arith.constant 1.000000e-07 : f32
      %34 = vector.broadcast %cst_23 : f32 to vector<2x1xf32>
      %35 = arith.addf %33, %34 : vector<2x1xf32>
      %36 = arith.divf %30, %35 : vector<2x1xf32>
      %c0_24 = arith.constant 0 : index
      %c0_25 = arith.constant 0 : index
      %37 = vector.load %arg5[%c0_24, %c0_25] : memref<2x1xf32, #tpu.memory_space<vmem>>, vector<2x1xf32>
      tpu.vector_store %arg5[%c0_24, %c0_25], %36 {strides = array<i32>} : memref<2x1xf32, #tpu.memory_space<vmem>>, vector<2x1xf32>,
    } else {
    }
    return
  }
  func.func @transform_0(%arg0: i32, %arg1: i32) -> (i32, i32) {
    %c0_i32 = arith.constant 0 : i32
    return %arg0, %arg1 : i32, i32
  }
  func.func @transform_1(%arg0: i32, %arg1: i32) -> (i32, i32) {
    %c0_i32 = arith.constant 0 : i32
    return %arg0, %arg1 : i32, i32
  }
  func.func @transform_2(%arg0: i32, %arg1: i32) -> (i32, i32) {
    %c0_i32 = arith.constant 0 : i32
    return %arg0, %arg1 : i32, i32
  }
  func.func @transform_3(%arg0: i32, %arg1: i32) -> (i32, i32) {
    %c0_i32 = arith.constant 0 : i32
    %c0_i32_0 = arith.constant 0 : i32
    return %arg0, %c0_i32 : i32, i32
  }
}

</mosaic_0001>

<bundles_post_ra>
// kernel: tpu_custom_call.1
= control target key start
LH: loop header
LB: loop body
LE: loop exit
PB: predicated region body
PF: predicated region fallthrough
CT: control target
= control target key end

     0   :  { %8 = vsyncpa [#allocation5], 0  ;;  %s116_s12 = smov [#allocation4]   ;;  %s165_s0 = inlined_call_operand.hbm [shape: f32[2,16], index: 0, kind: input, shape index: {}]   ;;  %s166_s1 = inlined_call_operand.vmem [shape: bf16[2,16], index: 1, kind: input, shape index: {}]   ;;  %s167_s2 = inlined_call_operand.vmem [shape: bf16[2,16], index: 2, kind: input, shape index: {}]   ;;  %s168_s3 = inlined_call_operand.vmem [shape: f32[2,1], index: 3, kind: output, shape index: {}]  }
   0x1   :  { %s15_s13 = sshll.u32 %s116_s12, 4  ;;  %s92_s16 = scalar_lea.hbm %s165_s0, 32  ;;  %s16_s13 = int_to_ptr.vmem [resolvable:$true] %s15_s13 }
   0x2   :  { %p93_p0 = scmp.ne.s32.totalorder %s165_s0, %s92_s16  ;;  %p96_p1 = scmp.lt.u32.totalorder %s92_s16, %s165_s0 }
   0x4   :  { %p98_p2 = pnand %p96_p1, %p93_p0 }
   0x6   :  { %101 = shalt.err (!%p98_p2)
}
   0x7   :  { %s102_s21 = scalar_lea.vmem %s16_s13, 32  ;;  %p107_p4 = scmp.lt.s32.totalorder %s16_s13, %s16_s13 }
   0x8   :  { %p103_p3 = scmp.ne.s32.totalorder %s16_s13, %s102_s21  ;;  %p108_p5 = scmp.lt.s32.totalorder %s102_s21, %s102_s21 }
   0xa   :  { %p109_p6 = por %p108_p5, %p107_p4 }
   0xc   :  { %p110_p7 = pnand %p109_p6, %p103_p3 }
   0xe   :  { %113 = shalt.err (!%p110_p7)
}
   0xf   :  { %18 = dma.hbm_to_vmem [thread:$0]  %s165_s0, 32, %s16_s13, [#allocation5]  }
  0x10   :  { %114 = dma.done.wait [#allocation5], 32  }
  0x11   :  { %115 = vsyncadd [#allocation5], 4294967264  ;;  %vm30_vm0 = vcmask 123904   ;;  %v117_v0 = vmov 0.0   ;;  %v33_v1 = vld [vmem:[#allocation4] sm:$0x3] }
  0x12   :  { %32 = vst.msk [vmem:[#allocation3] sm:$0x3] %vm30_vm0, %v117_v0  ;;  %31 = vst.msk [vmem:[#allocation2] sm:$0x3] %vm30_vm0, %v117_v0  ;;  %v36_v2 = vld [vmem:[%s167_s2] sm:$0x1] }
  0x13   :  { %v37_v3 = vunpack.c.l.bf16 %v36_v2  ;;  %v41_v4 = vand.u32 2147483647, %v33_v1  ;;  %v34_v13 = vld [vmem:[%s166_s1] sm:$0x1]  ;;  %v38_v17 = vmax.f32 %v33_v1, 0.0  ;;  %vm77_vm2 = vcmask 1024  }
  0x14   :  { %v35_v15 = vunpack.c.l.bf16 %v34_v13 }
  0x15   :  { %v42_v6 = vsub.f32 0.0, %v41_v4 }
  0x16   :  { %v39_v18 = vmul.f32 %v35_v15, %v33_v1 }
  0x17   :  { %v43_v8 = vmul.f32 1.442695, %v42_v6 }
  0x18   :  { %v40_v22 = vsub.f32 %v38_v17, %v39_v18 }
  0x19   :  { %v60_v5 = vld [vmem:[#allocation3] sm:$0x3]  ;;  %86 = vpow2.f32 %v43_v8  ;;  %v56_v26 = vld [vmem:[#allocation2] sm:$0x3] }
  0x1a   :  { %v61_v7 = vadd.f32 %v60_v5, %v37_v3 }
  0x1c   :  { %62 = vst.msk [vmem:[#allocation3] sm:$0x3] %vm30_vm0, %v61_v7 }
  0x23   :  { %v70_v9 = vld [vmem:[#allocation3] sm:$0x3]  ;;  %v87_v11 = vpop.eup %86 }
  0x24   :  { %v71_v10 = vsel %vm30_vm0, %v70_v9, 0.0  ;;  %v45_v12 = vadd.f32 1.0, %v87_v11  ;;  %v48_v14 = vmul.f32 -0.5, %v87_v11  ;;  %v51_v19 = vand.u32 2147483647, %v87_v11 }
  0x25   :  { %72 = vadd.xlane.f32.xlu0 %v71_v10 }
  0x26   :  { %88 = vlog2.f32 %v45_v12  ;;  %v49_v16 = vadd.f32 1.0, %v48_v14  ;;  %vm52_vm1 = vcmp.lt.f32.partialorder %v51_v19, 0.0004427343 }
  0x28   :  { %v50_v20 = vmul.f32 %v87_v11, %v49_v16 }
  0x30   :  { %v89_v21 = vpop.eup %88 }
  0x31   :  { %v47_v23 = vmul.f32 0.6931472, %v89_v21 }
  0x33   :  { %v53_v24 = vsel %vm52_vm1, %v50_v20, %v47_v23 }
  0x34   :  { %v54_v25 = vadd.f32 %v53_v24, %v40_v22 }
  0x36   :  { %v55_v27 = vmul.f32 %v54_v25, %v37_v3 }
  0x38   :  { %v57_v28 = vadd.f32 %v56_v26, %v55_v27 }
  0x3a   :  { %59 = vst.msk [vmem:[#allocation2] sm:$0x3] %vm30_vm0, %v57_v28 }
  0x41   :  { %v66_v29 = vld [vmem:[#allocation2] sm:$0x3] }
  0x42   :  { %v67_v30 = vsel %vm30_vm0, %v66_v29, 0.0 }
  0x43   :  { %68 = vadd.xlane.f32.xlu0 %v67_v30 }
  0xb2   :  { %v73_v31 = vpop.xlane.xlu0 %72 }
  0xb3   :  { %v74_v32 = vadd.f32 1e-07, %v73_v31 }
  0xb5   :  { %90 = vrcp.f32 %v74_v32 }
  0xbf   :  { %v91_v33 = vpop.eup %90 }
  0xd0   :  { %v69_v34 = vpop.xlane.xlu0 %68 }
  0xd1   :  { %v76_v35 = vmul.f32 %v91_v33, %v69_v34 }
  0xd3   :  { %78 = vst.msk [vmem:[%s168_s3] sm:$0x3] %vm77_vm2, %v76_v35 }
  0xd4   :  { %83 = vsyncpa [#allocation5], 1 }

</bundles_post_ra>
